<compile_context>
chip_gen: v7x
topology: tpu7x:2x2x1
jax: 0.10.0
libtpu: 0.0.40
codegen_flags: <defaults>
</compile_context>

<pallas_src>
import jax
import jax.numpy as jnp
from jax import lax
from jax.experimental import pallas as pl
from jax.experimental.pallas import tpu as pltpu

BN_EPS = 1e-5


def _stem_kernel(p_ref, wt_ref, gamma_ref, beta_ref, out_ref):
    """Fused conv-as-matmul + train-mode BatchNorm + ReLU.

    p_ref     : (K_pad, M)   f32  im2col patches^T (zero-padded contraction), VMEM
    wt_ref    : (Cout, K_pad) f32 repacked conv weight, VMEM
    gamma_ref : (Cout, 1)    f32  BN scale, VMEM
    beta_ref  : (Cout, 1)    f32  BN shift, VMEM
    out_ref   : (Cout, M)    f32  lane-dense output slab, VMEM
    """
    # --- single im2col matmul on the MXU: (Cout, Kp) @ (Kp, M) -> (Cout, M) ---
    acc = jnp.dot(wt_ref[...], p_ref[...], preferred_element_type=jnp.float32)

    # --- BatchNorm2d, training-mode: per-channel stats over all M = N*H*W ---
    mean = jnp.mean(acc, axis=1, keepdims=True)                    # (Cout, 1)
    diff = acc - mean
    var = jnp.mean(diff * diff, axis=1, keepdims=True)             # biased var
    inv_std = lax.rsqrt(var + BN_EPS)

    # Fold BN affine into one scale/shift pass over the big tensor.
    scale = gamma_ref[...] * inv_std                               # (Cout, 1)
    shift = beta_ref[...] - mean * scale                           # (Cout, 1)

    # --- normalize + ReLU, lane-dense unmasked store ---
    out_ref[...] = jnp.maximum(acc * scale + shift, 0.0).astype(out_ref.dtype)


def small_input_initial_block(x_nchw, w_oihw, gamma, beta):
    """x_nchw: (N, 3, H, W); w_oihw: (Cout, 3, 3, 3); gamma/beta: (Cout,).

    Returns (N, Cout, H, W) float32 — conv3x3(s=1,p=1) -> BN(train) -> ReLU.
    """
    N, Cin, H, W = x_nchw.shape
    Cout = w_oihw.shape[0]
    M = N * H * W
    K = 9 * Cin
    K_pad = ((K + 7) // 8) * 8          # 27 -> 32 (sublane-friendly, zero-padded)

    # ---- wrapper-side glue (plain XLA, fuses): im2col^T + weight repack ----
    # (Cin, N, H+2, W+2) zero-padded, channel-major so taps land contiguously.
    x_pad = jnp.pad(
        jnp.transpose(x_nchw.astype(jnp.float32), (1, 0, 2, 3)),
        ((0, 0), (0, 0), (1, 1), (1, 1)))
    taps = [x_pad[:, :, kh:kh + H, kw:kw + W]          # each (Cin, N, H, W)
            for kh in range(3) for kw in range(3)]
    # rows indexed by (tap, cin), cols by (n, h, w)  ->  (K, M), pad to (K_pad, M)
    patches_t = jnp.stack(taps, axis=0).reshape(K, M)
    patches_t = jnp.pad(patches_t, ((0, K_pad - K), (0, 0)))

    # weight (Cout, Cin, 3, 3) -> (Cout, kh, kw, Cin) -> (Cout, K) -> (Cout, K_pad)
    wt = jnp.transpose(w_oihw.astype(jnp.float32), (0, 2, 3, 1)).reshape(Cout, K)
    wt = jnp.pad(wt, ((0, 0), (0, K_pad - K)))

    gamma_col = gamma.astype(jnp.float32).reshape(Cout, 1)
    beta_col = beta.astype(jnp.float32).reshape(Cout, 1)

    vmem = pl.BlockSpec(memory_space=pltpu.MemorySpace.VMEM)
    out_cm = pl.pallas_call(
        _stem_kernel,
        out_shape=jax.ShapeDtypeStruct((Cout, M), jnp.float32),
        in_specs=[vmem, vmem, vmem, vmem],
        out_specs=vmem,
        compiler_params=pltpu.CompilerParams(vmem_limit_bytes=32 * 1024 * 1024),
    )(patches_t, wt, gamma_col, beta_col)

    # (Cout, N*H*W) -> (Cout, N, H, W) -> NCHW (N, Cout, H, W)
    return jnp.transpose(out_cm.reshape(Cout, N, H, W), (1, 0, 2, 3))


def _reference(x_nchw, w_oihw, gamma, beta):
    """Pure-JAX reference (conv + train-mode BN + ReLU), NCHW."""
    y = lax.conv_general_dilated(
        x_nchw.astype(jnp.float32), w_oihw.astype(jnp.float32),
        window_strides=(1, 1), padding=((1, 1), (1, 1)),
        dimension_numbers=("NCHW", "OIHW", "NCHW"))
    mean = jnp.mean(y, axis=(0, 2, 3), keepdims=True)
    var = jnp.mean((y - mean) ** 2, axis=(0, 2, 3), keepdims=True)
    yhat = (y - mean) / jnp.sqrt(var + BN_EPS)
    yhat = yhat * gamma.reshape(1, -1, 1, 1) + beta.reshape(1, -1, 1, 1)
    return jnp.maximum(yhat, 0.0)


if __name__ == "__main__":
    key = jax.random.PRNGKey(0)
    k_x, k_w, k_g, k_b = jax.random.split(key, 4)

    N, Cin, H, W = 2, 3, 16, 16
    init_planes = 32  # Cout

    x = jax.random.normal(k_x, (N, Cin, H, W), dtype=jnp.float32)
    # Deterministic synthetic conv weight (PyTorch would use kaiming uniform).
    fan_in = Cin * 3 * 3
    bound = 1.0 / (fan_in ** 0.5)
    w = jax.random.uniform(k_w, (init_planes, Cin, 3, 3),
                           minval=-bound, maxval=bound, dtype=jnp.float32)
    # BatchNorm affine params (perturbed from the 1/0 defaults to exercise them).
    gamma = 1.0 + 0.1 * jax.random.normal(k_g, (init_planes,), dtype=jnp.float32)
    beta = 0.1 * jax.random.normal(k_b, (init_planes,), dtype=jnp.float32)

    out = small_input_initial_block(x, w, gamma, beta)
    out = jax.block_until_ready(out)

    ref = _reference(x, w, gamma, beta)
    assert out.shape == (N, init_planes, H, W)
    assert jnp.allclose(out, ref, atol=1e-4, rtol=1e-4), "mismatch vs reference"

    print("KERNEL_OK")
</pallas_src>

<mosaic_0001>
module attributes {stable_mosaic.version = 11 : i64} {
  func.func @_stem_kernel(%arg0: memref<32x512xf32, #tpu.memory_space<vmem>>, %arg1: memref<32x32xf32, #tpu.memory_space<vmem>>, %arg2: memref<32x1xf32, #tpu.memory_space<vmem>>, %arg3: memref<32x1xf32, #tpu.memory_space<vmem>>, %arg4: memref<32x512xf32, #tpu.memory_space<vmem>>) attributes {dimension_semantics = [], scalar_prefetch = 0 : i64, scratch_operands = 0 : i64, tpu.core_type = #tpu.core_type<tc>} {
    %c0 = arith.constant 0 : index
    %c0_0 = arith.constant 0 : index
    %0 = vector.load %arg1[%c0, %c0_0] : memref<32x32xf32, #tpu.memory_space<vmem>>, vector<32x32xf32>
    %c0_1 = arith.constant 0 : index
    %c0_2 = arith.constant 0 : index
    %1 = vector.load %arg0[%c0_1, %c0_2] : memref<32x512xf32, #tpu.memory_space<vmem>>, vector<32x512xf32>
    %cst = arith.constant dense<0.000000e+00> : vector<32x512xf32>
    %2 = tpu.matmul %0, %1, %cst {dimension_numbers = #tpu.dot_dimension_numbers<[1], [0], [0], [1], [0, 0, 1, 1], [], []>} : vector<32x32xf32>, vector<32x512xf32>, vector<32x512xf32> -> vector<32x512xf32>
    %cst_3 = arith.constant dense<0.000000e+00> : vector<32xf32>
    %3 = vector.multi_reduction <add>, %2, %cst_3 [1] : vector<32x512xf32> to vector<32xf32>
    %4 = vector.shape_cast %3 : vector<32xf32> to vector<32x1xf32>
    %cst_4 = arith.constant 5.120000e+02 : f32
    %5 = vector.broadcast %cst_4 : f32 to vector<32x1xf32>
    %6 = arith.divf %4, %5 : vector<32x1xf32>
    %7 = vector.broadcast %6 : vector<32x1xf32> to vector<32x512xf32>
    %8 = arith.subf %2, %7 : vector<32x512xf32>
    %9 = arith.mulf %8, %8 : vector<32x512xf32>
    %cst_5 = arith.constant dense<0.000000e+00> : vector<32xf32>
    %10 = vector.multi_reduction <add>, %9, %cst_5 [1] : vector<32x512xf32> to vector<32xf32>
    %11 = vector.shape_cast %10 : vector<32xf32> to vector<32x1xf32>
    %cst_6 = arith.constant 5.120000e+02 : f32
    %12 = vector.broadcast %cst_6 : f32 to vector<32x1xf32>
    %13 = arith.divf %11, %12 : vector<32x1xf32>
    %cst_7 = arith.constant 9.99999974E-6 : f32
    %14 = vector.broadcast %cst_7 : f32 to vector<32x1xf32>
    %15 = arith.addf %13, %14 : vector<32x1xf32>
    %16 = math.rsqrt %15 : vector<32x1xf32>
    %c0_8 = arith.constant 0 : index
    %c0_9 = arith.constant 0 : index
    %17 = vector.load %arg2[%c0_8, %c0_9] : memref<32x1xf32, #tpu.memory_space<vmem>>, vector<32x1xf32>
    %18 = arith.mulf %17, %16 : vector<32x1xf32>
    %c0_10 = arith.constant 0 : index
    %c0_11 = arith.constant 0 : index
    %19 = vector.load %arg3[%c0_10, %c0_11] : memref<32x1xf32, #tpu.memory_space<vmem>>, vector<32x1xf32>
    %20 = arith.mulf %6, %18 : vector<32x1xf32>
    %21 = arith.subf %19, %20 : vector<32x1xf32>
    %22 = vector.broadcast %18 : vector<32x1xf32> to vector<32x512xf32>
    %23 = arith.mulf %2, %22 : vector<32x512xf32>
    %24 = vector.broadcast %21 : vector<32x1xf32> to vector<32x512xf32>
    %25 = arith.addf %23, %24 : vector<32x512xf32>
    %cst_12 = arith.constant 0.000000e+00 : f32
    %26 = vector.broadcast %cst_12 : f32 to vector<32x512xf32>
    %27 = arith.maximumf %25, %26 : vector<32x512xf32>
    %c0_13 = arith.constant 0 : index
    %c0_14 = arith.constant 0 : index
    %28 = vector.load %arg4[%c0_13, %c0_14] : memref<32x512xf32, #tpu.memory_space<vmem>>, vector<32x512xf32>
    tpu.vector_store %arg4[%c0_13, %c0_14], %27 {strides = array<i32>} : memref<32x512xf32, #tpu.memory_space<vmem>>, vector<32x512xf32>,
    return
  }
}

</mosaic_0001>

<bundles_post_ra>
// kernel: tpu_custom_call.1
= control target key start
LH: loop header
LB: loop body
LE: loop exit
PB: predicated region body
PF: predicated region fallthrough
CT: control target
= control target key end

     0   :  { %9 = vsyncpa [#allocation3], 0  ;;  %s774_s0 = inlined_call_operand.hbm [shape: f32[32,512], index: 0, kind: input, shape index: {}]   ;;  %s775_s1 = inlined_call_operand.vmem [shape: f32[32,32], index: 1, kind: input, shape index: {}]   ;;  %s776_s2 = inlined_call_operand.vmem [shape: f32[32,1], index: 2, kind: input, shape index: {}]   ;;  %s777_s3 = inlined_call_operand.vmem [shape: f32[32,1], index: 3, kind: input, shape index: {}]   ;;  %s778_s4 = inlined_call_operand.hbm [shape: f32[32,512], index: 4, kind: output, shape index: {}]  }
   0x1   :  { %10 = vsyncpa [#allocation4], 0  ;;  %s561_s15 = smov [#allocation2]   ;;  %s513_s19 = scalar_lea.hbm %s774_s0, 2048 }
   0x2   :  { %s16_s16 = sshll.u32 %s561_s15, 4  ;;  %p514_p0 = scmp.ne.s32.totalorder %s774_s0, %s513_s19  ;;  %s17_s16 = int_to_ptr.vmem [resolvable:$true] %s16_s16 }
   0x3   :  { %p517_p1 = scmp.lt.u32.totalorder %s513_s19, %s774_s0 }
   0x5   :  { %p519_p2 = pnand %p517_p1, %p514_p0 }
   0x7   :  { %522 = shalt.err (!%p519_p2)
}
   0x8   :  { %s523_s24 = scalar_lea.vmem %s17_s16, 2048  ;;  %p528_p4 = scmp.lt.s32.totalorder %s17_s16, %s17_s16 }
   0x9   :  { %p524_p3 = scmp.ne.s32.totalorder %s17_s16, %s523_s24  ;;  %p529_p5 = scmp.lt.s32.totalorder %s523_s24, %s523_s24 }
   0xb   :  { %p530_p6 = por %p529_p5, %p528_p4 }
   0xd   :  { %p531_p7 = pnand %p530_p6, %p524_p3 }
   0xf   :  { %534 = shalt.err (!%p531_p7)
}
  0x10   :  { %s562_s25 = smov 512   ;;  %s563_s26 = smov 32  }
  0x11   :  { %22 = dma.hbm_to_vmem [thread:$0]  %s774_s0, 2048, %s17_s16, [#allocation3], %s562_s25, %s562_s25, %s563_s26  }
  0x12   :  { %557 = dma.done.wait [#allocation3], 2048  }
  0x13   :  { %558 = vsyncadd [#allocation3], 4294965248  ;;  %v564_v0 = vmov 0.0   ;;  %v37_v1 = vld [vmem:[#allocation2 + $0x8] sm:$0xff]  ;;  %v36_v3 = vld [vmem:[#allocation2] sm:$0xff]  ;;  %vm52_vm0 = vcmask 261120  }
  0x14   :  { %129 = vmatprep.mubr.f32.mxu0 %v564_v0  ;;  %218 = vmatprep.mubr.f32.mxu1 %v564_v0  ;;  %v41_v2 = vld [vmem:[#allocation2 + $0x28] sm:$0xff]  ;;  %v40_v5 = vld [vmem:[#allocation2 + $0x20] sm:$0xff]  ;;  %v39_v6 = vld [vmem:[#allocation2 + $0x18] sm:$0xff] }
  0x15   :  { %v481_v4 = vpack.c.bf16 %v41_v2, %v37_v1  ;;  %v43_v7 = vld [vmem:[#allocation2 + $0x38] sm:$0xff]  ;;  %v483_v8 = vpack.c.bf16 %v40_v5, %v36_v3  ;;  %v38_v10 = vld [vmem:[#allocation2 + $0x10] sm:$0xff]  ;;  %v45_v12 = vld [vmem:[#allocation2 + $0x48] sm:$0xff] }
  0x16   :  { %v489_v9 = vpack.c.bf16 %v43_v7, %v39_v6  ;;  %v42_v11 = vld [vmem:[#allocation2 + $0x30] sm:$0xff]  ;;  %v49_v14 = vld [vmem:[#allocation2 + $0x68] sm:$0xff]  ;;  %v44_v15 = vld [vmem:[#allocation2 + $0x40] sm:$0xff] }
  0x17   :  { %482 = vmatprep.subr.bf16.mxu0 %v481_v4  ;;  %v491_v13 = vpack.c.bf16 %v42_v11, %v38_v10  ;;  %v48_v16 = vld [vmem:[#allocation2 + $0x60] sm:$0xff]  ;;  %v485_v17 = vpack.c.bf16 %v49_v14, %v45_v12  ;;  %v47_v19 = vld [vmem:[#allocation2 + $0x58] sm:$0xff]  ;;  %v46_v21 = vld [vmem:[#allocation2 + $0x50] sm:$0xff] }
  0x18   :  { %484 = vmatpush1.bf16.msra.mxu0 %v483_v8  ;;  %490 = vmatprep.subr.bf16.mxu1 %v489_v9  ;;  %v487_v18 = vpack.c.bf16 %v48_v16, %v44_v15  ;;  %v51_v20 = vld [vmem:[#allocation2 + $0x78] sm:$0xff]  ;;  %v50_v23 = vld [vmem:[#allocation2 + $0x70] sm:$0xff]  ;;  %v32_v25 = vld [vmem:[%s775_s1] sm:$0xff] }
  0x19   :  { %492 = vmatpush1.bf16.msra.mxu1 %v491_v13  ;;  %v493_v22 = vpack.c.bf16 %v51_v20, %v47_v19  ;;  %486 = vmatprep.subr.bf16.mxu0 %v485_v17  ;;  %v495_v24 = vpack.c.bf16 %v50_v23, %v46_v21  ;;  %v33_v26 = vld [vmem:[%s775_s1 + $0x8] sm:$0xff]  ;;  %v34_v27 = vld [vmem:[%s775_s1 + $0x10] sm:$0xff]  ;;  %v35_v28 = vld [vmem:[%s775_s1 + $0x18] sm:$0xff] }
  0x1b   :  { %494 = vmatprep.subr.bf16.mxu1 %v493_v22 }
  0x1c   :  { %488 = vmatpush1.bf16.msra.mxu0 %v487_v18 }
  0x1d   :  { %496 = vmatpush1.bf16.msra.mxu1 %v495_v24 }
  0x1f   :  { %473 = vmatmul.mubr.msk.f32.vlgmr.msra.gmra.mrb[0].mxu0 %vm52_vm0, %v32_v25 }
  0x20   :  { %477 = vmatmul.mubr.msk.f32.vlgmr.msra.gmra.mrb[0].mxu1 %vm52_vm0, %v32_v25  ;;  %135 = vmatprep.mubr.f32.mxu0 %v564_v0 }
  0x21   :  { %224 = vmatprep.mubr.f32.mxu1 %v564_v0 }
  0x23   :  { %474 = vmatmul.mubr.msk.f32.gmra.mrb[2].mxu0 %vm52_vm0, %v33_v26 }
  0x24   :  { %478 = vmatmul.mubr.msk.f32.gmra.mrb[2].mxu1 %vm52_vm0, %v33_v26  ;;  %141 = vmatprep.mubr.f32.mxu0 %v564_v0 }
  0x25   :  { %230 = vmatprep.mubr.f32.mxu1 %v564_v0 }
  0x27   :  { %475 = vmatmul.mubr.msk.f32.gmra.mrb[4].mxu0 %vm52_vm0, %v34_v27 }
  0x28   :  { %147 = vmatprep.mubr.f32.mxu0 %v564_v0  ;;  %479 = vmatmul.mubr.msk.f32.gmra.mrb[4].mxu1 %vm52_vm0, %v34_v27 }
  0x29   :  { %236 = vmatprep.mubr.f32.mxu1 %v564_v0 }
  0x2b   :  { %476 = vmatmul.mubr.msk.f32.gmra.mrb[6].mxu0 %vm52_vm0, %v35_v28 }
  0x2c   :  { %480 = vmatmul.mubr.msk.f32.gmra.mrb[6].mxu1 %vm52_vm0, %v35_v28 }
  0xf2   :  { %v627_v29 = vpop.f32.mrb[0].mxu0 }
  0xf3   :  { %v629_v30 = vpop.f32.mrb[1].mxu0  ;;  %v631_v31 = vpop.f32.mrb[0].mxu1 }
  0xf4   :  { %v243_v32 = vadd.f32 %v629_v30, %v627_v29  ;;  %v635_v33 = vpop.f32.mrb[1].mxu1 }
  0xf6   :  { %v637_v34 = vpop.f32.mrb[2].mxu0  ;;  %v244_v35 = vadd.f32 %v243_v32, %v631_v31 }
  0xf7   :  { %v640_v36 = vpop.f32.mrb[3].mxu0  ;;  %v642_v37 = vpop.f32.mrb[2].mxu1 }
  0xf8   :  { %v248_v38 = vadd.f32 %v640_v36, %v637_v34  ;;  %v646_v39 = vpop.f32.mrb[3].mxu1  ;;  %v245_v40 = vadd.f32 %v244_v35, %v635_v33 }
  0xfa   :  { %246 = vadd.xlane.f32.xlu0 %v245_v40  ;;  %v649_v41 = vpop.f32.mrb[4].mxu0  ;;  %v249_v42 = vadd.f32 %v248_v38, %v642_v37 }
  0xfb   :  { %v652_v43 = vpop.f32.mrb[5].mxu0  ;;  %v654_v44 = vpop.f32.mrb[4].mxu1 }
  0xfc   :  { %v253_v45 = vadd.f32 %v652_v43, %v649_v41  ;;  %v250_v46 = vadd.f32 %v249_v42, %v646_v39  ;;  %v659_v47 = vpop.f32.mrb[5].mxu1 }
  0xfe   :  { %251 = vadd.xlane.f32.xlu0 %v250_v46  ;;  %v661_v48 = vpop.f32.mrb[6].mxu0  ;;  %v254_v49 = vadd.f32 %v253_v45, %v654_v44 }
  0xff   :  { %v664_v50 = vpop.f32.mrb[7].mxu0  ;;  %v666_v51 = vpop.f32.mrb[6].mxu1 }
 0x100   :  { %v258_v52 = vadd.f32 %v664_v50, %v661_v48  ;;  %v255_v53 = vadd.f32 %v254_v49, %v659_v47  ;;  %v671_v54 = vpop.f32.mrb[7].mxu1 }
 0x102   :  { %256 = vadd.xlane.f32.xlu1 %v255_v53  ;;  %v259_v55 = vadd.f32 %v258_v52, %v666_v51 }
 0x104   :  { %v260_v56 = vadd.f32 %v259_v55, %v671_v54 }
 0x106   :  { %261 = vadd.xlane.f32.xlu1 %v260_v56 }
 0x187   :  { %v247_v57 = vpop.xlane.xlu0 %246 }
 0x188   :  { %v675_v58 = vmul.f32 0.001953125, %v247_v57 }
 0x18a   :  { %v268_v59 = vsub.f32 %v627_v29, %v675_v58  ;;  %v269_v60 = vsub.f32 %v629_v30, %v675_v58  ;;  %v270_v61 = vsub.f32 %v631_v31, %v675_v58  ;;  %v271_v63 = vsub.f32 %v635_v33, %v675_v58 }
 0x18b   :  { %v252_v62 = vpop.xlane.xlu0 %251 }
 0x18c   :  { %v685_v0 = vmul.f32 0.001953125, %v252_v62  ;;  %v284_v1 = vmul.f32 %v268_v59, %v268_v59  ;;  %v285_v2 = vmul.f32 %v269_v60, %v269_v60  ;;  %v286_v3 = vmul.f32 %v270_v61, %v270_v61 }
 0x18d   :  { %v287_v9 = vmul.f32 %v271_v63, %v271_v63  ;;  %v565_v62 = vmov 0  }
 0x18e   :  { %v300_v4 = vadd.f32 %v285_v2, %v284_v1  ;;  %v272_v5 = vsub.f32 %v637_v34, %v685_v0  ;;  %v273_v6 = vsub.f32 %v640_v36, %v685_v0  ;;  %v274_v7 = vsub.f32 %v642_v37, %v685_v0  ;;  %503 = vset.pattern.permute.xlu0 %v565_v62 }
 0x18f   :  { %v257_v8 = vpop.xlane.xlu1 %256  ;;  %v275_v10 = vsub.f32 %v646_v39, %v685_v0  ;;  %504 = vset.pattern.permute.xlu1 %v565_v62 }
 0x190   :  { %v695_v11 = vmul.f32 0.001953125, %v257_v8  ;;  %v301_v12 = vadd.f32 %v300_v4, %v286_v3  ;;  %v288_v13 = vmul.f32 %v272_v5, %v272_v5  ;;  %v289_v14 = vmul.f32 %v273_v6, %v273_v6 }
 0x191   :  { %v290_v15 = vmul.f32 %v274_v7, %v274_v7  ;;  %v291_v21 = vmul.f32 %v275_v10, %v275_v10  ;;  %v332_v10 = vld [vmem:[%s776_s2] sm:$0xff] }
 0x192   :  { %v302_v16 = vadd.f32 %v301_v12, %v287_v9  ;;  %v305_v17 = vadd.f32 %v289_v14, %v288_v13  ;;  %v276_v18 = vsub.f32 %v649_v41, %v695_v11  ;;  %v277_v19 = vsub.f32 %v652_v43, %v695_v11 }
 0x193   :  { %v262_v20 = vpop.xlane.xlu1 %261  ;;  %v278_v22 = vsub.f32 %v654_v44, %v695_v11  ;;  %v279_v23 = vsub.f32 %v659_v47, %v695_v11 }
 0x194   :  { %v705_v24 = vmul.f32 0.001953125, %v262_v20  ;;  %303 = vadd.xlane.f32.xlu0 %v302_v16  ;;  %v306_v25 = vadd.f32 %v305_v17, %v290_v15  ;;  %v292_v26 = vmul.f32 %v276_v18, %v276_v18  ;;  %v293_v27 = vmul.f32 %v277_v19, %v277_v19  ;;  %v333_v15 = vld [vmem:[%s776_s2 + $0x8] sm:$0xff]  ;;  %v340_v20 = vld [vmem:[%s777_s3] sm:$0xff] }
 0x195   :  { %v294_v28 = vmul.f32 %v278_v22, %v278_v22  ;;  %v295_v42 = vmul.f32 %v279_v23, %v279_v23  ;;  %v334_v23 = vld [vmem:[%s776_s2 + $0x10] sm:$0xff] }
 0x196   :  { %v307_v32 = vadd.f32 %v306_v25, %v291_v21  ;;  %v310_v35 = vadd.f32 %v293_v27, %v292_v26  ;;  %v280_v38 = vsub.f32 %v661_v48, %v705_v24  ;;  %v281_v40 = vsub.f32 %v664_v50, %v705_v24 }
 0x197   :  { %v282_v45 = vsub.f32 %v666_v51, %v705_v24  ;;  %v283_v49 = vsub.f32 %v671_v54, %v705_v24 }
 0x198   :  { %308 = vadd.xlane.f32.xlu1 %v307_v32  ;;  %v311_v46 = vadd.f32 %v310_v35, %v294_v28  ;;  %v296_v52 = vmul.f32 %v280_v38, %v280_v38  ;;  %v297_v53 = vmul.f32 %v281_v40, %v281_v40  ;;  %v335_v32 = vld [vmem:[%s776_s2 + $0x18] sm:$0xff]  ;;  %v342_v40 = vld [vmem:[%s777_s3 + $0x10] sm:$0xff]  ;;  %s566_s2 = smov [#allocation5]  }
 0x199   :  { %v298_v56 = vmul.f32 %v282_v45, %v282_v45  ;;  %v299_v59 = vmul.f32 %v283_v49, %v283_v49  ;;  %v343_v45 = vld [vmem:[%s777_s3 + $0x18] sm:$0xff] }
 0x19a   :  { %v312_v55 = vadd.f32 %v311_v46, %v295_v42  ;;  %v315_v57 = vadd.f32 %v297_v53, %v296_v52 }
 0x19c   :  { %313 = vadd.xlane.f32.xlu0 %v312_v55  ;;  %v316_v60 = vadd.f32 %v315_v57, %v298_v56 }
 0x19e   :  { %v317_v61 = vadd.f32 %v316_v60, %v299_v59 }
 0x1a0   :  { %318 = vadd.xlane.f32.xlu1 %v317_v61 }
 0x221   :  { %v304_v63 = vpop.xlane.xlu0 %303 }
 0x222   :  { %v320_v1 = vmul.f32 0.001953125, %v304_v63 }
 0x224   :  { %v324_v2 = vadd.f32 1e-05, %v320_v1 }
 0x225   :  { %v309_v3 = vpop.xlane.xlu1 %308 }
 0x226   :  { %505 = vrsqrt.f32 %v324_v2  ;;  %v321_v4 = vmul.f32 0.001953125, %v309_v3 }
 0x228   :  { %v325_v5 = vadd.f32 1e-05, %v321_v4 }
 0x229   :  { %v314_v6 = vpop.xlane.xlu0 %313 }
 0x22a   :  { %507 = vrsqrt.f32 %v325_v5  ;;  %v322_v7 = vmul.f32 0.001953125, %v314_v6 }
 0x22c   :  { %v326_v8 = vadd.f32 1e-05, %v322_v7 }
 0x22d   :  { %v319_v9 = vpop.xlane.xlu1 %318 }
 0x22e   :  { %509 = vrsqrt.f32 %v326_v8  ;;  %v323_v13 = vmul.f32 0.001953125, %v319_v9 }
 0x230   :  { %v506_v12 = vpop.eup %505  ;;  %v327_v17 = vadd.f32 1e-05, %v323_v13 }
 0x231   :  { %v336_v14 = vmul.f32 %v506_v12, %v332_v10 }
 0x232   :  { %511 = vrsqrt.f32 %v327_v17 }
 0x233   :  { %354 = vperm.xlu0 %503, %v336_v14   ;;  %v344_v19 = vmul.f32 %v336_v14, %v675_v58  ;;  %v341_v58 = vld [vmem:[%s777_s3 + $0x8] sm:$0xff]  ;;  %s461_s3 = sshll.u32 %s566_s2, 4  ;;  %s462_s3 = int_to_ptr.vmem [resolvable:$true] %s461_s3 }
 0x234   :  { %v508_v16 = vpop.eup %507  ;;  %s535_s27 = scalar_lea.vmem %s462_s3, 2048  ;;  %p540_p9 = scmp.lt.s32.totalorder %s462_s3, %s462_s3 }
 0x235   :  { %v337_v18 = vmul.f32 %v508_v16, %v333_v15  ;;  %v348_v21 = vsub.f32 %v340_v20, %v344_v19  ;;  %p536_p8 = scmp.ne.s32.totalorder %s462_s3, %s535_s27  ;;  %p541_p10 = scmp.lt.s32.totalorder %s535_s27, %s535_s27 }
 0x237   :  { %359 = vperm.xlu1 %504, %v337_v18   ;;  %v345_v26 = vmul.f32 %v337_v18, %v685_v0  ;;  %p542_p11 = por %p541_p10, %p540_p9 }
 0x238   :  { %v510_v22 = vpop.eup %509 }
 0x239   :  { %v338_v25 = vmul.f32 %v510_v22, %v334_v23  ;;  %v349_v27 = vsub.f32 %v341_v58, %v345_v26  ;;  %p543_p12 = pnand %p542_p11, %p536_p8 }
 0x23b   :  { %390 = vperm.xlu1 %504, %v348_v21   ;;  %v346_v38 = vmul.f32 %v338_v25, %v695_v11 }
 0x23c   :  { %v512_v28 = vpop.eup %511 }
 0x23d   :  { %v339_v35 = vmul.f32 %v512_v28, %v335_v32  ;;  %v350_v0 = vsub.f32 %v342_v40, %v346_v38 }
 0x23f   :  { %364 = vperm.xlu1 %504, %v338_v25   ;;  %v347_v42 = vmul.f32 %v339_v35, %v705_v24 }
 0x241   :  { %v351_v46 = vsub.f32 %v343_v45, %v347_v42 }
 0x243   :  { %395 = vperm.xlu1 %504, %v349_v27  }
 0x247   :  { %369 = vperm.xlu1 %504, %v339_v35  }
 0x24b   :  { %400 = vperm.xlu1 %504, %v350_v0  }
 0x24f   :  { %405 = vperm.xlu1 %504, %v351_v46  }
 0x2b2   :  { %v355_v49 = vpop.permute.xlu0 %354 }
 0x2b3   :  { %v372_v53 = vmul.f32 %v355_v49, %v627_v29  ;;  %v373_v11 = vmul.f32 %v355_v49, %v629_v30  ;;  %v374_v55 = vmul.f32 %v355_v49, %v631_v31  ;;  %v375_v56 = vmul.f32 %v355_v49, %v635_v33 }
 0x2b6   :  { %v360_v52 = vpop.permute.xlu1 %359 }
 0x2b7   :  { %v376_v29 = vmul.f32 %v360_v52, %v637_v34  ;;  %v377_v30 = vmul.f32 %v360_v52, %v640_v36  ;;  %v378_v31 = vmul.f32 %v360_v52, %v642_v37  ;;  %v379_v33 = vmul.f32 %v360_v52, %v646_v39 }
 0x2ba   :  { %v391_v57 = vpop.permute.xlu1 %390 }
 0x2bb   :  { %v408_v59 = vadd.f32 %v391_v57, %v372_v53  ;;  %v409_v24 = vadd.f32 %v391_v57, %v373_v11  ;;  %v410_v60 = vadd.f32 %v391_v57, %v374_v55  ;;  %v411_v61 = vadd.f32 %v391_v57, %v375_v56 }
 0x2bd   :  { %v424_v62 = vmax.f32 %v408_v59, 0.0  ;;  %v425_v63 = vmax.f32 %v409_v24, 0.0  ;;  %v426_v1 = vmax.f32 %v410_v60, 0.0  ;;  %v427_v2 = vmax.f32 %v411_v61, 0.0 }
 0x2be   :  { %v365_v3 = vpop.permute.xlu1 %364 }
 0x2bf   :  { %440 = vst [vmem:[#allocation5] sm:$0xff] %v424_v62  ;;  %441 = vst [vmem:[#allocation5 + $0x8] sm:$0xff] %v425_v63  ;;  %v380_v34 = vmul.f32 %v365_v3, %v649_v41  ;;  %v381_v36 = vmul.f32 %v365_v3, %v652_v43  ;;  %v382_v37 = vmul.f32 %v365_v3, %v654_v44 }
 0x2c0   :  { %442 = vst [vmem:[#allocation5 + $0x10] sm:$0xff] %v426_v1  ;;  %443 = vst [vmem:[#allocation5 + $0x18] sm:$0xff] %v427_v2  ;;  %v383_v39 = vmul.f32 %v365_v3, %v659_v47 }
 0x2c2   :  { %v396_v4 = vpop.permute.xlu1 %395 }
 0x2c3   :  { %v412_v5 = vadd.f32 %v396_v4, %v376_v29  ;;  %v413_v6 = vadd.f32 %v396_v4, %v377_v30  ;;  %v414_v7 = vadd.f32 %v396_v4, %v378_v31  ;;  %v415_v8 = vadd.f32 %v396_v4, %v379_v33 }
 0x2c5   :  { %v428_v9 = vmax.f32 %v412_v5, 0.0  ;;  %v429_v10 = vmax.f32 %v413_v6, 0.0  ;;  %v430_v12 = vmax.f32 %v414_v7, 0.0  ;;  %v431_v13 = vmax.f32 %v415_v8, 0.0 }
 0x2c6   :  { %v370_v14 = vpop.permute.xlu1 %369 }
 0x2c7   :  { %444 = vst [vmem:[#allocation5 + $0x20] sm:$0xff] %v428_v9  ;;  %445 = vst [vmem:[#allocation5 + $0x28] sm:$0xff] %v429_v10  ;;  %v384_v20 = vmul.f32 %v370_v14, %v661_v48  ;;  %v385_v21 = vmul.f32 %v370_v14, %v664_v50  ;;  %v386_v22 = vmul.f32 %v370_v14, %v666_v51 }
 0x2c8   :  { %446 = vst [vmem:[#allocation5 + $0x30] sm:$0xff] %v430_v12  ;;  %447 = vst [vmem:[#allocation5 + $0x38] sm:$0xff] %v431_v13  ;;  %v387_v23 = vmul.f32 %v370_v14, %v671_v54 }
 0x2ca   :  { %v401_v15 = vpop.permute.xlu1 %400 }
 0x2cb   :  { %v416_v16 = vadd.f32 %v401_v15, %v380_v34  ;;  %v417_v17 = vadd.f32 %v401_v15, %v381_v36  ;;  %v418_v18 = vadd.f32 %v401_v15, %v382_v37  ;;  %v419_v19 = vadd.f32 %v401_v15, %v383_v39 }
 0x2cd   :  { %v432_v41 = vmax.f32 %v416_v16, 0.0  ;;  %v433_v25 = vmax.f32 %v417_v17, 0.0  ;;  %v434_v43 = vmax.f32 %v418_v18, 0.0  ;;  %v435_v26 = vmax.f32 %v419_v19, 0.0 }
 0x2ce   :  { %v406_v44 = vpop.permute.xlu1 %405 }
 0x2cf   :  { %448 = vst [vmem:[#allocation5 + $0x40] sm:$0xff] %v432_v41  ;;  %449 = vst [vmem:[#allocation5 + $0x48] sm:$0xff] %v433_v25  ;;  %v420_v47 = vadd.f32 %v406_v44, %v384_v20  ;;  %v421_v58 = vadd.f32 %v406_v44, %v385_v21  ;;  %v422_v48 = vadd.f32 %v406_v44, %v386_v22 }
 0x2d0   :  { %450 = vst [vmem:[#allocation5 + $0x50] sm:$0xff] %v434_v43  ;;  %451 = vst [vmem:[#allocation5 + $0x58] sm:$0xff] %v435_v26  ;;  %v423_v27 = vadd.f32 %v406_v44, %v387_v23 }
 0x2d1   :  { %v436_v50 = vmax.f32 %v420_v47, 0.0  ;;  %v437_v28 = vmax.f32 %v421_v58, 0.0  ;;  %v438_v51 = vmax.f32 %v422_v48, 0.0 }
 0x2d2   :  { %v439_v32 = vmax.f32 %v423_v27, 0.0 }
 0x2d3   :  { %452 = vst [vmem:[#allocation5 + $0x60] sm:$0xff] %v436_v50  ;;  %453 = vst [vmem:[#allocation5 + $0x68] sm:$0xff] %v437_v28 }
 0x2d4   :  { %454 = vst [vmem:[#allocation5 + $0x70] sm:$0xff] %v438_v51  ;;  %455 = vst [vmem:[#allocation5 + $0x78] sm:$0xff] %v439_v32 }
 0x2d5   :  { %546 = shalt.err (!%p543_p12)
}
 0x2d6   :  { %s547_s29 = scalar_lea.hbm %s778_s4, 2048 }
 0x2d7   :  { %p548_p13 = scmp.ne.s32.totalorder %s778_s4, %s547_s29  ;;  %p551_p0 = scmp.lt.u32.totalorder %s547_s29, %s778_s4 }
 0x2d9   :  { %p553_p1 = pnand %p551_p0, %p548_p13 }
 0x2db   :  { %556 = shalt.err (!%p553_p1)
}
 0x2dc   :  { %467 = dma.vmem_to_hbm [thread:$0]  %s462_s3, 2048, %s778_s4, [#allocation4], %s562_s25, %s562_s25, %s563_s26  }
 0x2dd   :  { %559 = dma.done.wait [#allocation4], 2048  }
 0x2de   :  { %560 = vsyncadd [#allocation4], 4294965248 }
 0x2df   :  { %471 = vsyncpa [#allocation3], 1 }
 0x2e0   :  { %472 = vsyncpa [#allocation4], 1 }

</bundles_post_ra>
